<compile_context>
chip_gen: v6e
topology: v6e:2x2x1
jax: 0.10.0
libtpu: 0.0.40
codegen_flags: <defaults>
</compile_context>

<pallas_src>
import jax
import jax.numpy as jnp
from jax import lax
from jax.experimental import pallas as pl
from jax.experimental.pallas import tpu as pltpu

LANE = 128


def _round_up(n, m):
    return ((n + m - 1) // m) * m


def combined_kernel(
    ids_ref,        # (T*B, 1) int32  time-major flattened token ids (VMEM)
    lex_tbl_ref,    # (V, 4*H)        folded emb_lex @ W_ih
    blstm_ref,      # (1, 4*H)        LSTM bias (b_ih + b_hh)
    whh_ref,        # (H, 4*H)        LSTM hidden->gates weight (pre-transposed)
    stat_tbl_ref,   # (V, Hs)         folded emb_stat @ W1
    b1_ref,         # (1, Hs)
    w2_ref,         # (Hs, Hs)        stat fc2 (pre-transposed)
    b2_ref,         # (1, Hs)
    wc_ref,         # (H + Hs, C)     combined_fc (pre-transposed)
    bc_ref,         # (1, C)
    wo_ref,         # (C, Vp)         output_fc (pre-transposed, lane-padded)
    bo_ref,         # (1, Vp)
    nm_ref,         # (1, 1)          neuromodulator scalar (SMEM)
    out_ref,        # (B, Vp)         padded logits
):
    TB = ids_ref.shape[0]
    B = out_ref.shape[0]
    T = TB // B
    V = lex_tbl_ref.shape[0]
    H = whh_ref.shape[0]

    # ---- One-hot encoding of the (time-major) token ids --------------------
    # Selection by 0/1 multipliers is exact through the f32 MXU path.
    ids = ids_ref[...]                                          # (T*B, 1) i32
    vocab_iota = lax.broadcasted_iota(jnp.int32, (TB, V), 1)    # (T*B, V)
    onehot = (vocab_iota == ids).astype(jnp.float32)            # (T*B, V)

    # ---- Lexical branch: folded gather+input-projection, then LSTM ---------
    # xproj = emb_lex[ids] @ W_ih + b   (fold is exact: both ops are linear)
    xproj = (jnp.dot(onehot, lex_tbl_ref[...],
                     preferred_element_type=jnp.float32)
             + blstm_ref[...])                                  # (T*B, 4H)

    whh = whh_ref[...]                                          # (H, 4H)
    h = jnp.zeros((B, H), jnp.float32)
    c = jnp.zeros((B, H), jnp.float32)
    # T is small & static: fully unroll so each step's h @ W_hh MXU push can
    # overlap the previous step's EUP / VPU elementwise work.
    for t in range(T):
        gates = xproj[t * B:(t + 1) * B, :] + jnp.dot(
            h, whh, preferred_element_type=jnp.float32)         # (B, 4H)
        # PyTorch gate ordering: i, f, g, o. Two EUP passes per step:
        sig = jax.nn.sigmoid(gates)                             # full slab
        g_g = jnp.tanh(gates[:, 2 * H:3 * H])                   # 32-lane g
        i_g = sig[:, 0 * H:1 * H]
        f_g = sig[:, 1 * H:2 * H]
        o_g = sig[:, 3 * H:4 * H]
        c = f_g * c + i_g * g_g
        h = o_g * jnp.tanh(c)

    # ---- Statistical branch: mean over time folded through fc1 -------------
    # mean_t(emb_stat[ids]) @ W1 == (mean_t onehot) @ (emb_stat @ W1)
    counts = onehot[0:B, :]
    for t in range(1, T):
        counts = counts + onehot[t * B:(t + 1) * B, :]
    avg_onehot = counts * (1.0 / T)                             # (B, V)
    s1 = jnp.maximum(
        jnp.dot(avg_onehot, stat_tbl_ref[...],
                preferred_element_type=jnp.float32) + b1_ref[...], 0.0)
    s2 = jnp.maximum(
        jnp.dot(s1, w2_ref[...],
                preferred_element_type=jnp.float32) + b2_ref[...], 0.0)

    # ---- Fusion head --------------------------------------------------------
    nm = nm_ref[0, 0]                                           # scalar (sreg)
    # cat([h, s2], 1) * nm followed by combined_fc, without a lane concat:
    wc_lex = wc_ref[0:H, :]                                     # (H, C)
    wc_stat = wc_ref[H:, :]                                     # (Hs, C)
    pre = (
        jnp.dot(h, wc_lex, preferred_element_type=jnp.float32)
        + jnp.dot(s2, wc_stat, preferred_element_type=jnp.float32)
    ) * nm + bc_ref[...]
    hidden = jnp.maximum(pre, 0.0)                              # (B, C)

    # Lane-dense (B, Vp) store; valid vocab columns sliced outside.
    out_ref[...] = (
        jnp.dot(hidden, wo_ref[...], preferred_element_type=jnp.float32)
        + bo_ref[...]
    )


def combined_forward(input_ids, params):
    """input_ids: (B, T) int token ids -> (B, V) f32 logits."""
    B, T = input_ids.shape
    V = params["lex_tbl"].shape[0]
    Vp = params["wo_p"].shape[1]
    H = params["whh"].shape[0]
    Hs = params["w2"].shape[0]
    C = params["wc"].shape[1]

    # Tiny glue only (256 B at B=T=8): time-major flatten of the ids.
    ids_tm = jnp.transpose(input_ids.astype(jnp.int32)).reshape(T * B, 1)

    vmem = pl.BlockSpec(memory_space=pltpu.MemorySpace.VMEM)
    smem = pl.BlockSpec(memory_space=pltpu.MemorySpace.SMEM)

    operands = (
        ids_tm,
        params["lex_tbl"], params["blstm"], params["whh"],
        params["stat_tbl"], params["b1"], params["w2"], params["b2"],
        params["wc"], params["bc"],
        params["wo_p"], params["bo_p"],
        params["nm"],
    )
    in_specs = [vmem] * (len(operands) - 1) + [smem]

    # Advisory cost hint: the kernel is tiny & latency-bound.
    tb = T * B
    flops = 2 * (tb * V * 4 * H        # folded gather + input projection
                 + T * B * H * 4 * H   # recurrence
                 + B * V * Hs          # folded stat gather + fc1
                 + B * Hs * Hs         # fc2
                 + B * (H + Hs) * C    # combined_fc
                 + B * C * Vp)         # output_fc
    transcendentals = T * (B * 4 * H + 2 * B * H)
    bytes_accessed = sum(a.size * a.dtype.itemsize for a in operands) \
        + B * Vp * 4

    logits_p = pl.pallas_call(
        combined_kernel,
        out_shape=jax.ShapeDtypeStruct((B, Vp), jnp.float32),
        in_specs=in_specs,
        out_specs=vmem,
        cost_estimate=pl.CostEstimate(
            flops=flops,
            transcendentals=transcendentals,
            bytes_accessed=bytes_accessed),
    )(*operands)
    return logits_p[:, :V]


def init_params(key, vocab_size, d_lex, d_stat, combined_hidden):
    ks = jax.random.split(key, 16)
    s = 0.1
    H = d_lex  # lexical hidden == lexical embed (per module __init__)
    Vp = _round_up(vocab_size, LANE)
    hi = jax.lax.Precision.HIGHEST

    emb_lex = s * jax.random.normal(ks[0], (vocab_size, d_lex), jnp.float32)
    emb_stat = s * jax.random.normal(ks[1], (vocab_size, d_stat), jnp.float32)
    # LSTM weights stored pre-transposed (in_features, 4H); gate order i,f,g,o.
    wih = s * jax.random.normal(ks[2], (d_lex, 4 * H), jnp.float32)
    whh = s * jax.random.normal(ks[3], (H, 4 * H), jnp.float32)
    # NOTE: when porting real PyTorch weights this must be b_ih + b_hh (summed).
    blstm = s * jax.random.normal(ks[4], (1, 4 * H), jnp.float32)
    w1 = s * jax.random.normal(ks[5], (d_stat, d_stat), jnp.float32)
    b1 = s * jax.random.normal(ks[6], (1, d_stat), jnp.float32)
    w2 = s * jax.random.normal(ks[7], (d_stat, d_stat), jnp.float32)
    b2 = s * jax.random.normal(ks[8], (1, d_stat), jnp.float32)
    wc = s * jax.random.normal(ks[9], (H + d_stat, combined_hidden), jnp.float32)
    bc = s * jax.random.normal(ks[10], (1, combined_hidden), jnp.float32)

    wo = s * jax.random.normal(ks[11], (combined_hidden, vocab_size), jnp.float32)
    bo = s * jax.random.normal(ks[12], (1, vocab_size), jnp.float32)
    # Lane-pad the output projection once at init (zeros in padded columns).
    wo_p = jnp.zeros((combined_hidden, Vp), jnp.float32).at[:, :vocab_size].set(wo)
    bo_p = jnp.zeros((1, Vp), jnp.float32).at[:, :vocab_size].set(bo)

    params = {
        # Exact linear folds, computed once at init in full precision:
        "lex_tbl": jnp.dot(emb_lex, wih, precision=hi),      # (V, 4H)
        "stat_tbl": jnp.dot(emb_stat, w1, precision=hi),     # (V, Hs)
        "blstm": blstm,
        "whh": whh,
        "b1": b1,
        "w2": w2,
        "b2": b2,
        "wc": wc,
        "bc": bc,
        "wo_p": wo_p,
        "bo_p": bo_p,
        "nm": jnp.ones((1, 1), jnp.float32),  # neuromodulator initialized to 1.0
    }
    return params


if __name__ == "__main__":
    # Small shapes consistent with the module's forward.
    VOCAB = 32
    D_LEX = 32
    D_STAT = 32
    COMBINED_HIDDEN = 32
    B, T = 8, 8

    key = jax.random.PRNGKey(0)
    k_ids, k_params = jax.random.split(key)
    input_ids = jax.random.randint(k_ids, (B, T), 0, VOCAB, dtype=jnp.int32)
    params = init_params(k_params, VOCAB, D_LEX, D_STAT, COMBINED_HIDDEN)

    fwd = jax.jit(combined_forward)
    logits = fwd(input_ids, params)
    jax.block_until_ready(logits)
    assert logits.shape == (B, VOCAB), logits.shape
    assert bool(jnp.all(jnp.isfinite(logits))), "non-finite logits"
    print("KERNEL_OK")
</pallas_src>

<mosaic_0001>
module attributes {stable_mosaic.version = 11 : i64} {
  func.func @combined_kernel(%arg0: memref<64x1xi32, #tpu.memory_space<vmem>>, %arg1: memref<32x128xf32, #tpu.memory_space<vmem>>, %arg2: memref<1x128xf32, #tpu.memory_space<vmem>>, %arg3: memref<32x128xf32, #tpu.memory_space<vmem>>, %arg4: memref<32x32xf32, #tpu.memory_space<vmem>>, %arg5: memref<1x32xf32, #tpu.memory_space<vmem>>, %arg6: memref<32x32xf32, #tpu.memory_space<vmem>>, %arg7: memref<1x32xf32, #tpu.memory_space<vmem>>, %arg8: memref<64x32xf32, #tpu.memory_space<vmem>>, %arg9: memref<1x32xf32, #tpu.memory_space<vmem>>, %arg10: memref<32x128xf32, #tpu.memory_space<vmem>>, %arg11: memref<1x128xf32, #tpu.memory_space<vmem>>, %arg12: memref<1x1xf32, #tpu.memory_space<smem>>, %arg13: memref<8x128xf32, #tpu.memory_space<vmem>>) attributes {dimension_semantics = [], scalar_prefetch = 0 : i64, scratch_operands = 0 : i64, tpu.core_type = #tpu.core_type<tc>} {
    %c0 = arith.constant 0 : index
    %c0_0 = arith.constant 0 : index
    %0 = vector.load %arg0[%c0, %c0_0] : memref<64x1xi32, #tpu.memory_space<vmem>>, vector<64x1xi32>
    %1 = tpu.iota {dimensions = array<i32: 1>} : vector<64x32xi32>
    %2 = vector.broadcast %0 : vector<64x1xi32> to vector<64x32xi32>
    %3 = arith.cmpi eq, %1, %2 : vector<64x32xi32>
    %4 = arith.extui %3 : vector<64x32xi1> to vector<64x32xi32>
    %5 = arith.sitofp %4 : vector<64x32xi32> to vector<64x32xf32>
    %c0_1 = arith.constant 0 : index
    %c0_2 = arith.constant 0 : index
    %6 = vector.load %arg1[%c0_1, %c0_2] : memref<32x128xf32, #tpu.memory_space<vmem>>, vector<32x128xf32>
    %cst = arith.constant dense<0.000000e+00> : vector<64x128xf32>
    %7 = tpu.matmul %5, %6, %cst {dimension_numbers = #tpu.dot_dimension_numbers<[1], [0], [0], [1], [0, 0, 1, 1], [], []>} : vector<64x32xf32>, vector<32x128xf32>, vector<64x128xf32> -> vector<64x128xf32>
    %c0_3 = arith.constant 0 : index
    %c0_4 = arith.constant 0 : index
    %8 = vector.load %arg2[%c0_3, %c0_4] : memref<1x128xf32, #tpu.memory_space<vmem>>, vector<1x128xf32>
    %9 = vector.broadcast %8 : vector<1x128xf32> to vector<64x128xf32>
    %10 = arith.addf %7, %9 : vector<64x128xf32>
    %c0_5 = arith.constant 0 : index
    %c0_6 = arith.constant 0 : index
    %11 = vector.load %arg3[%c0_5, %c0_6] : memref<32x128xf32, #tpu.memory_space<vmem>>, vector<32x128xf32>
    %cst_7 = arith.constant 0.000000e+00 : f32
    %12 = vector.broadcast %cst_7 : f32 to vector<8x32xf32>
    %cst_8 = arith.constant 0.000000e+00 : f32
    %13 = vector.broadcast %cst_8 : f32 to vector<8x32xf32>
    %14 = vector.extract_strided_slice %10 {offsets = [0, 0], sizes = [8, 128], strides = [1, 1]} : vector<64x128xf32> to vector<8x128xf32>
    %cst_9 = arith.constant dense<0.000000e+00> : vector<8x128xf32>
    %15 = tpu.matmul %12, %11, %cst_9 {dimension_numbers = #tpu.dot_dimension_numbers<[1], [0], [0], [1], [0, 0, 1, 1], [], []>} : vector<8x32xf32>, vector<32x128xf32>, vector<8x128xf32> -> vector<8x128xf32>
    %16 = arith.addf %14, %15 : vector<8x128xf32>
    %17 = arith.negf %16 : vector<8x128xf32>
    %18 = math.exp %17 : vector<8x128xf32>
    %cst_10 = arith.constant 1.000000e+00 : f32
    %19 = vector.broadcast %cst_10 : f32 to vector<8x128xf32>
    %20 = arith.addf %19, %18 : vector<8x128xf32>
    %21 = arith.divf %19, %20 : vector<8x128xf32>
    %22 = vector.extract_strided_slice %16 {offsets = [0, 64], sizes = [8, 32], strides = [1, 1]} : vector<8x128xf32> to vector<8x32xf32>
    %23 = math.tanh %22 : vector<8x32xf32>
    %24 = vector.extract_strided_slice %21 {offsets = [0, 0], sizes = [8, 32], strides = [1, 1]} : vector<8x128xf32> to vector<8x32xf32>
    %25 = vector.extract_strided_slice %21 {offsets = [0, 32], sizes = [8, 32], strides = [1, 1]} : vector<8x128xf32> to vector<8x32xf32>
    %26 = vector.extract_strided_slice %21 {offsets = [0, 96], sizes = [8, 32], strides = [1, 1]} : vector<8x128xf32> to vector<8x32xf32>
    %27 = arith.mulf %25, %13 : vector<8x32xf32>
    %28 = arith.mulf %24, %23 : vector<8x32xf32>
    %29 = arith.addf %27, %28 : vector<8x32xf32>
    %30 = math.tanh %29 : vector<8x32xf32>
    %31 = arith.mulf %26, %30 : vector<8x32xf32>
    %32 = vector.extract_strided_slice %10 {offsets = [8, 0], sizes = [8, 128], strides = [1, 1]} : vector<64x128xf32> to vector<8x128xf32>
    %cst_11 = arith.constant dense<0.000000e+00> : vector<8x128xf32>
    %33 = tpu.matmul %31, %11, %cst_11 {dimension_numbers = #tpu.dot_dimension_numbers<[1], [0], [0], [1], [0, 0, 1, 1], [], []>} : vector<8x32xf32>, vector<32x128xf32>, vector<8x128xf32> -> vector<8x128xf32>
    %34 = arith.addf %32, %33 : vector<8x128xf32>
    %35 = arith.negf %34 : vector<8x128xf32>
    %36 = math.exp %35 : vector<8x128xf32>
    %cst_12 = arith.constant 1.000000e+00 : f32
    %37 = vector.broadcast %cst_12 : f32 to vector<8x128xf32>
    %38 = arith.addf %37, %36 : vector<8x128xf32>
    %39 = arith.divf %37, %38 : vector<8x128xf32>
    %40 = vector.extract_strided_slice %34 {offsets = [0, 64], sizes = [8, 32], strides = [1, 1]} : vector<8x128xf32> to vector<8x32xf32>
    %41 = math.tanh %40 : vector<8x32xf32>
    %42 = vector.extract_strided_slice %39 {offsets = [0, 0], sizes = [8, 32], strides = [1, 1]} : vector<8x128xf32> to vector<8x32xf32>
    %43 = vector.extract_strided_slice %39 {offsets = [0, 32], sizes = [8, 32], strides = [1, 1]} : vector<8x128xf32> to vector<8x32xf32>
    %44 = vector.extract_strided_slice %39 {offsets = [0, 96], sizes = [8, 32], strides = [1, 1]} : vector<8x128xf32> to vector<8x32xf32>
    %45 = arith.mulf %43, %29 : vector<8x32xf32>
    %46 = arith.mulf %42, %41 : vector<8x32xf32>
    %47 = arith.addf %45, %46 : vector<8x32xf32>
    %48 = math.tanh %47 : vector<8x32xf32>
    %49 = arith.mulf %44, %48 : vector<8x32xf32>
    %50 = vector.extract_strided_slice %10 {offsets = [16, 0], sizes = [8, 128], strides = [1, 1]} : vector<64x128xf32> to vector<8x128xf32>
    %cst_13 = arith.constant dense<0.000000e+00> : vector<8x128xf32>
    %51 = tpu.matmul %49, %11, %cst_13 {dimension_numbers = #tpu.dot_dimension_numbers<[1], [0], [0], [1], [0, 0, 1, 1], [], []>} : vector<8x32xf32>, vector<32x128xf32>, vector<8x128xf32> -> vector<8x128xf32>
    %52 = arith.addf %50, %51 : vector<8x128xf32>
    %53 = arith.negf %52 : vector<8x128xf32>
    %54 = math.exp %53 : vector<8x128xf32>
    %cst_14 = arith.constant 1.000000e+00 : f32
    %55 = vector.broadcast %cst_14 : f32 to vector<8x128xf32>
    %56 = arith.addf %55, %54 : vector<8x128xf32>
    %57 = arith.divf %55, %56 : vector<8x128xf32>
    %58 = vector.extract_strided_slice %52 {offsets = [0, 64], sizes = [8, 32], strides = [1, 1]} : vector<8x128xf32> to vector<8x32xf32>
    %59 = math.tanh %58 : vector<8x32xf32>
    %60 = vector.extract_strided_slice %57 {offsets = [0, 0], sizes = [8, 32], strides = [1, 1]} : vector<8x128xf32> to vector<8x32xf32>
    %61 = vector.extract_strided_slice %57 {offsets = [0, 32], sizes = [8, 32], strides = [1, 1]} : vector<8x128xf32> to vector<8x32xf32>
    %62 = vector.extract_strided_slice %57 {offsets = [0, 96], sizes = [8, 32], strides = [1, 1]} : vector<8x128xf32> to vector<8x32xf32>
    %63 = arith.mulf %61, %47 : vector<8x32xf32>
    %64 = arith.mulf %60, %59 : vector<8x32xf32>
    %65 = arith.addf %63, %64 : vector<8x32xf32>
    %66 = math.tanh %65 : vector<8x32xf32>
    %67 = arith.mulf %62, %66 : vector<8x32xf32>
    %68 = vector.extract_strided_slice %10 {offsets = [24, 0], sizes = [8, 128], strides = [1, 1]} : vector<64x128xf32> to vector<8x128xf32>
    %cst_15 = arith.constant dense<0.000000e+00> : vector<8x128xf32>
    %69 = tpu.matmul %67, %11, %cst_15 {dimension_numbers = #tpu.dot_dimension_numbers<[1], [0], [0], [1], [0, 0, 1, 1], [], []>} : vector<8x32xf32>, vector<32x128xf32>, vector<8x128xf32> -> vector<8x128xf32>
    %70 = arith.addf %68, %69 : vector<8x128xf32>
    %71 = arith.negf %70 : vector<8x128xf32>
    %72 = math.exp %71 : vector<8x128xf32>
    %cst_16 = arith.constant 1.000000e+00 : f32
    %73 = vector.broadcast %cst_16 : f32 to vector<8x128xf32>
    %74 = arith.addf %73, %72 : vector<8x128xf32>
    %75 = arith.divf %73, %74 : vector<8x128xf32>
    %76 = vector.extract_strided_slice %70 {offsets = [0, 64], sizes = [8, 32], strides = [1, 1]} : vector<8x128xf32> to vector<8x32xf32>
    %77 = math.tanh %76 : vector<8x32xf32>
    %78 = vector.extract_strided_slice %75 {offsets = [0, 0], sizes = [8, 32], strides = [1, 1]} : vector<8x128xf32> to vector<8x32xf32>
    %79 = vector.extract_strided_slice %75 {offsets = [0, 32], sizes = [8, 32], strides = [1, 1]} : vector<8x128xf32> to vector<8x32xf32>
    %80 = vector.extract_strided_slice %75 {offsets = [0, 96], sizes = [8, 32], strides = [1, 1]} : vector<8x128xf32> to vector<8x32xf32>
    %81 = arith.mulf %79, %65 : vector<8x32xf32>
    %82 = arith.mulf %78, %77 : vector<8x32xf32>
    %83 = arith.addf %81, %82 : vector<8x32xf32>
    %84 = math.tanh %83 : vector<8x32xf32>
    %85 = arith.mulf %80, %84 : vector<8x32xf32>
    %86 = vector.extract_strided_slice %10 {offsets = [32, 0], sizes = [8, 128], strides = [1, 1]} : vector<64x128xf32> to vector<8x128xf32>
    %cst_17 = arith.constant dense<0.000000e+00> : vector<8x128xf32>
    %87 = tpu.matmul %85, %11, %cst_17 {dimension_numbers = #tpu.dot_dimension_numbers<[1], [0], [0], [1], [0, 0, 1, 1], [], []>} : vector<8x32xf32>, vector<32x128xf32>, vector<8x128xf32> -> vector<8x128xf32>
    %88 = arith.addf %86, %87 : vector<8x128xf32>
    %89 = arith.negf %88 : vector<8x128xf32>
    %90 = math.exp %89 : vector<8x128xf32>
    %cst_18 = arith.constant 1.000000e+00 : f32
    %91 = vector.broadcast %cst_18 : f32 to vector<8x128xf32>
    %92 = arith.addf %91, %90 : vector<8x128xf32>
    %93 = arith.divf %91, %92 : vector<8x128xf32>
    %94 = vector.extract_strided_slice %88 {offsets = [0, 64], sizes = [8, 32], strides = [1, 1]} : vector<8x128xf32> to vector<8x32xf32>
    %95 = math.tanh %94 : vector<8x32xf32>
    %96 = vector.extract_strided_slice %93 {offsets = [0, 0], sizes = [8, 32], strides = [1, 1]} : vector<8x128xf32> to vector<8x32xf32>
    %97 = vector.extract_strided_slice %93 {offsets = [0, 32], sizes = [8, 32], strides = [1, 1]} : vector<8x128xf32> to vector<8x32xf32>
    %98 = vector.extract_strided_slice %93 {offsets = [0, 96], sizes = [8, 32], strides = [1, 1]} : vector<8x128xf32> to vector<8x32xf32>
    %99 = arith.mulf %97, %83 : vector<8x32xf32>
    %100 = arith.mulf %96, %95 : vector<8x32xf32>
    %101 = arith.addf %99, %100 : vector<8x32xf32>
    %102 = math.tanh %101 : vector<8x32xf32>
    %103 = arith.mulf %98, %102 : vector<8x32xf32>
    %104 = vector.extract_strided_slice %10 {offsets = [40, 0], sizes = [8, 128], strides = [1, 1]} : vector<64x128xf32> to vector<8x128xf32>
    %cst_19 = arith.constant dense<0.000000e+00> : vector<8x128xf32>
    %105 = tpu.matmul %103, %11, %cst_19 {dimension_numbers = #tpu.dot_dimension_numbers<[1], [0], [0], [1], [0, 0, 1, 1], [], []>} : vector<8x32xf32>, vector<32x128xf32>, vector<8x128xf32> -> vector<8x128xf32>
    %106 = arith.addf %104, %105 : vector<8x128xf32>
    %107 = arith.negf %106 : vector<8x128xf32>
    %108 = math.exp %107 : vector<8x128xf32>
    %cst_20 = arith.constant 1.000000e+00 : f32
    %109 = vector.broadcast %cst_20 : f32 to vector<8x128xf32>
    %110 = arith.addf %109, %108 : vector<8x128xf32>
    %111 = arith.divf %109, %110 : vector<8x128xf32>
    %112 = vector.extract_strided_slice %106 {offsets = [0, 64], sizes = [8, 32], strides = [1, 1]} : vector<8x128xf32> to vector<8x32xf32>
    %113 = math.tanh %112 : vector<8x32xf32>
    %114 = vector.extract_strided_slice %111 {offsets = [0, 0], sizes = [8, 32], strides = [1, 1]} : vector<8x128xf32> to vector<8x32xf32>
    %115 = vector.extract_strided_slice %111 {offsets = [0, 32], sizes = [8, 32], strides = [1, 1]} : vector<8x128xf32> to vector<8x32xf32>
    %116 = vector.extract_strided_slice %111 {offsets = [0, 96], sizes = [8, 32], strides = [1, 1]} : vector<8x128xf32> to vector<8x32xf32>
    %117 = arith.mulf %115, %101 : vector<8x32xf32>
    %118 = arith.mulf %114, %113 : vector<8x32xf32>
    %119 = arith.addf %117, %118 : vector<8x32xf32>
    %120 = math.tanh %119 : vector<8x32xf32>
    %121 = arith.mulf %116, %120 : vector<8x32xf32>
    %122 = vector.extract_strided_slice %10 {offsets = [48, 0], sizes = [8, 128], strides = [1, 1]} : vector<64x128xf32> to vector<8x128xf32>
    %cst_21 = arith.constant dense<0.000000e+00> : vector<8x128xf32>
    %123 = tpu.matmul %121, %11, %cst_21 {dimension_numbers = #tpu.dot_dimension_numbers<[1], [0], [0], [1], [0, 0, 1, 1], [], []>} : vector<8x32xf32>, vector<32x128xf32>, vector<8x128xf32> -> vector<8x128xf32>
    %124 = arith.addf %122, %123 : vector<8x128xf32>
    %125 = arith.negf %124 : vector<8x128xf32>
    %126 = math.exp %125 : vector<8x128xf32>
    %cst_22 = arith.constant 1.000000e+00 : f32
    %127 = vector.broadcast %cst_22 : f32 to vector<8x128xf32>
    %128 = arith.addf %127, %126 : vector<8x128xf32>
    %129 = arith.divf %127, %128 : vector<8x128xf32>
    %130 = vector.extract_strided_slice %124 {offsets = [0, 64], sizes = [8, 32], strides = [1, 1]} : vector<8x128xf32> to vector<8x32xf32>
    %131 = math.tanh %130 : vector<8x32xf32>
    %132 = vector.extract_strided_slice %129 {offsets = [0, 0], sizes = [8, 32], strides = [1, 1]} : vector<8x128xf32> to vector<8x32xf32>
    %133 = vector.extract_strided_slice %129 {offsets = [0, 32], sizes = [8, 32], strides = [1, 1]} : vector<8x128xf32> to vector<8x32xf32>
    %134 = vector.extract_strided_slice %129 {offsets = [0, 96], sizes = [8, 32], strides = [1, 1]} : vector<8x128xf32> to vector<8x32xf32>
    %135 = arith.mulf %133, %119 : vector<8x32xf32>
    %136 = arith.mulf %132, %131 : vector<8x32xf32>
    %137 = arith.addf %135, %136 : vector<8x32xf32>
    %138 = math.tanh %137 : vector<8x32xf32>
    %139 = arith.mulf %134, %138 : vector<8x32xf32>
    %140 = vector.extract_strided_slice %10 {offsets = [56, 0], sizes = [8, 128], strides = [1, 1]} : vector<64x128xf32> to vector<8x128xf32>
    %cst_23 = arith.constant dense<0.000000e+00> : vector<8x128xf32>
    %141 = tpu.matmul %139, %11, %cst_23 {dimension_numbers = #tpu.dot_dimension_numbers<[1], [0], [0], [1], [0, 0, 1, 1], [], []>} : vector<8x32xf32>, vector<32x128xf32>, vector<8x128xf32> -> vector<8x128xf32>
    %142 = arith.addf %140, %141 : vector<8x128xf32>
    %143 = arith.negf %142 : vector<8x128xf32>
    %144 = math.exp %143 : vector<8x128xf32>
    %cst_24 = arith.constant 1.000000e+00 : f32
    %145 = vector.broadcast %cst_24 : f32 to vector<8x128xf32>
    %146 = arith.addf %145, %144 : vector<8x128xf32>
    %147 = arith.divf %145, %146 : vector<8x128xf32>
    %148 = vector.extract_strided_slice %142 {offsets = [0, 64], sizes = [8, 32], strides = [1, 1]} : vector<8x128xf32> to vector<8x32xf32>
    %149 = math.tanh %148 : vector<8x32xf32>
    %150 = vector.extract_strided_slice %147 {offsets = [0, 0], sizes = [8, 32], strides = [1, 1]} : vector<8x128xf32> to vector<8x32xf32>
    %151 = vector.extract_strided_slice %147 {offsets = [0, 32], sizes = [8, 32], strides = [1, 1]} : vector<8x128xf32> to vector<8x32xf32>
    %152 = vector.extract_strided_slice %147 {offsets = [0, 96], sizes = [8, 32], strides = [1, 1]} : vector<8x128xf32> to vector<8x32xf32>
    %153 = arith.mulf %151, %137 : vector<8x32xf32>
    %154 = arith.mulf %150, %149 : vector<8x32xf32>
    %155 = arith.addf %153, %154 : vector<8x32xf32>
    %156 = math.tanh %155 : vector<8x32xf32>
    %157 = arith.mulf %152, %156 : vector<8x32xf32>
    %158 = vector.extract_strided_slice %5 {offsets = [0, 0], sizes = [8, 32], strides = [1, 1]} : vector<64x32xf32> to vector<8x32xf32>
    %159 = vector.extract_strided_slice %5 {offsets = [8, 0], sizes = [8, 32], strides = [1, 1]} : vector<64x32xf32> to vector<8x32xf32>
    %160 = arith.addf %158, %159 : vector<8x32xf32>
    %161 = vector.extract_strided_slice %5 {offsets = [16, 0], sizes = [8, 32], strides = [1, 1]} : vector<64x32xf32> to vector<8x32xf32>
    %162 = arith.addf %160, %161 : vector<8x32xf32>
    %163 = vector.extract_strided_slice %5 {offsets = [24, 0], sizes = [8, 32], strides = [1, 1]} : vector<64x32xf32> to vector<8x32xf32>
    %164 = arith.addf %162, %163 : vector<8x32xf32>
    %165 = vector.extract_strided_slice %5 {offsets = [32, 0], sizes = [8, 32], strides = [1, 1]} : vector<64x32xf32> to vector<8x32xf32>
    %166 = arith.addf %164, %165 : vector<8x32xf32>
    %167 = vector.extract_strided_slice %5 {offsets = [40, 0], sizes = [8, 32], strides = [1, 1]} : vector<64x32xf32> to vector<8x32xf32>
    %168 = arith.addf %166, %167 : vector<8x32xf32>
    %169 = vector.extract_strided_slice %5 {offsets = [48, 0], sizes = [8, 32], strides = [1, 1]} : vector<64x32xf32> to vector<8x32xf32>
    %170 = arith.addf %168, %169 : vector<8x32xf32>
    %171 = vector.extract_strided_slice %5 {offsets = [56, 0], sizes = [8, 32], strides = [1, 1]} : vector<64x32xf32> to vector<8x32xf32>
    %172 = arith.addf %170, %171 : vector<8x32xf32>
    %cst_25 = arith.constant 1.250000e-01 : f32
    %173 = vector.broadcast %cst_25 : f32 to vector<8x32xf32>
    %174 = arith.mulf %172, %173 : vector<8x32xf32>
    %c0_26 = arith.constant 0 : index
    %c0_27 = arith.constant 0 : index
    %175 = vector.load %arg4[%c0_26, %c0_27] : memref<32x32xf32, #tpu.memory_space<vmem>>, vector<32x32xf32>
    %cst_28 = arith.constant dense<0.000000e+00> : vector<8x32xf32>
    %176 = tpu.matmul %174, %175, %cst_28 {dimension_numbers = #tpu.dot_dimension_numbers<[1], [0], [0], [1], [0, 0, 1, 1], [], []>} : vector<8x32xf32>, vector<32x32xf32>, vector<8x32xf32> -> vector<8x32xf32>
    %c0_29 = arith.constant 0 : index
    %c0_30 = arith.constant 0 : index
    %177 = vector.load %arg5[%c0_29, %c0_30] : memref<1x32xf32, #tpu.memory_space<vmem>>, vector<1x32xf32>
    %178 = vector.broadcast %177 : vector<1x32xf32> to vector<8x32xf32>
    %179 = arith.addf %176, %178 : vector<8x32xf32>
    %cst_31 = arith.constant 0.000000e+00 : f32
    %180 = vector.broadcast %cst_31 : f32 to vector<8x32xf32>
    %181 = arith.maximumf %179, %180 : vector<8x32xf32>
    %c0_32 = arith.constant 0 : index
    %c0_33 = arith.constant 0 : index
    %182 = vector.load %arg6[%c0_32, %c0_33] : memref<32x32xf32, #tpu.memory_space<vmem>>, vector<32x32xf32>
    %cst_34 = arith.constant dense<0.000000e+00> : vector<8x32xf32>
    %183 = tpu.matmul %181, %182, %cst_34 {dimension_numbers = #tpu.dot_dimension_numbers<[1], [0], [0], [1], [0, 0, 1, 1], [], []>} : vector<8x32xf32>, vector<32x32xf32>, vector<8x32xf32> -> vector<8x32xf32>
    %c0_35 = arith.constant 0 : index
    %c0_36 = arith.constant 0 : index
    %184 = vector.load %arg7[%c0_35, %c0_36] : memref<1x32xf32, #tpu.memory_space<vmem>>, vector<1x32xf32>
    %185 = vector.broadcast %184 : vector<1x32xf32> to vector<8x32xf32>
    %186 = arith.addf %183, %185 : vector<8x32xf32>
    %cst_37 = arith.constant 0.000000e+00 : f32
    %187 = vector.broadcast %cst_37 : f32 to vector<8x32xf32>
    %188 = arith.maximumf %186, %187 : vector<8x32xf32>
    %c0_38 = arith.constant 0 : index
    %c0_39 = arith.constant 0 : index
    %189 = memref.load %arg12[%c0_38, %c0_39] : memref<1x1xf32, #tpu.memory_space<smem>>
    %c0_40 = arith.constant 0 : index
    %c0_41 = arith.constant 0 : index
    %190 = vector.load %arg8[%c0_40, %c0_41] : memref<64x32xf32, #tpu.memory_space<vmem>>, vector<32x32xf32>
    %c32 = arith.constant 32 : index
    %c0_42 = arith.constant 0 : index
    %191 = vector.load %arg8[%c32, %c0_42] : memref<64x32xf32, #tpu.memory_space<vmem>>, vector<32x32xf32>
    %cst_43 = arith.constant dense<0.000000e+00> : vector<8x32xf32>
    %192 = tpu.matmul %157, %190, %cst_43 {dimension_numbers = #tpu.dot_dimension_numbers<[1], [0], [0], [1], [0, 0, 1, 1], [], []>} : vector<8x32xf32>, vector<32x32xf32>, vector<8x32xf32> -> vector<8x32xf32>
    %cst_44 = arith.constant dense<0.000000e+00> : vector<8x32xf32>
    %193 = tpu.matmul %188, %191, %cst_44 {dimension_numbers = #tpu.dot_dimension_numbers<[1], [0], [0], [1], [0, 0, 1, 1], [], []>} : vector<8x32xf32>, vector<32x32xf32>, vector<8x32xf32> -> vector<8x32xf32>
    %194 = arith.addf %192, %193 : vector<8x32xf32>
    %195 = vector.broadcast %189 : f32 to vector<8x32xf32>
    %196 = arith.mulf %194, %195 : vector<8x32xf32>
    %c0_45 = arith.constant 0 : index
    %c0_46 = arith.constant 0 : index
    %197 = vector.load %arg9[%c0_45, %c0_46] : memref<1x32xf32, #tpu.memory_space<vmem>>, vector<1x32xf32>
    %198 = vector.broadcast %197 : vector<1x32xf32> to vector<8x32xf32>
    %199 = arith.addf %196, %198 : vector<8x32xf32>
    %cst_47 = arith.constant 0.000000e+00 : f32
    %200 = vector.broadcast %cst_47 : f32 to vector<8x32xf32>
    %201 = arith.maximumf %199, %200 : vector<8x32xf32>
    %c0_48 = arith.constant 0 : index
    %c0_49 = arith.constant 0 : index
    %202 = vector.load %arg10[%c0_48, %c0_49] : memref<32x128xf32, #tpu.memory_space<vmem>>, vector<32x128xf32>
    %cst_50 = arith.constant dense<0.000000e+00> : vector<8x128xf32>
    %203 = tpu.matmul %201, %202, %cst_50 {dimension_numbers = #tpu.dot_dimension_numbers<[1], [0], [0], [1], [0, 0, 1, 1], [], []>} : vector<8x32xf32>, vector<32x128xf32>, vector<8x128xf32> -> vector<8x128xf32>
    %c0_51 = arith.constant 0 : index
    %c0_52 = arith.constant 0 : index
    %204 = vector.load %arg11[%c0_51, %c0_52] : memref<1x128xf32, #tpu.memory_space<vmem>>, vector<1x128xf32>
    %205 = vector.broadcast %204 : vector<1x128xf32> to vector<8x128xf32>
    %206 = arith.addf %203, %205 : vector<8x128xf32>
    %c0_53 = arith.constant 0 : index
    %c0_54 = arith.constant 0 : index
    %207 = vector.load %arg13[%c0_53, %c0_54] : memref<8x128xf32, #tpu.memory_space<vmem>>, vector<8x128xf32>
    tpu.vector_store %arg13[%c0_53, %c0_54], %206 {strides = array<i32>} : memref<8x128xf32, #tpu.memory_space<vmem>>, vector<8x128xf32>,
    return
  }
}

</mosaic_0001>

<bundles_post_ra>
// kernel: combined_forward.1
= control target key start
LH: loop header
LB: loop body
LE: loop exit
PB: predicated region body
PF: predicated region fallthrough
CT: control target
= control target key end

     0   :  { %19 = vsyncpa [#allocation4], 0  ;;  %s2404_s0 = inlined_call_operand.vmem [shape: s32[64,1], index: 0, kind: input, shape index: {}]   ;;  %s2405_s1 = inlined_call_operand.vmem [shape: f32[32,128], index: 1, kind: input, shape index: {}]   ;;  %s2406_s2 = inlined_call_operand.vmem [shape: f32[1,128], index: 2, kind: input, shape index: {}]   ;;  %s2407_s3 = inlined_call_operand.vmem [shape: f32[32,128], index: 3, kind: input, shape index: {}]   ;;  %s2408_s4 = inlined_call_operand.vmem [shape: f32[32,32], index: 4, kind: input, shape index: {}]   ;;  %s2409_s5 = inlined_call_operand.hbm [shape: f32[1,32], index: 5, kind: input, shape index: {}]   ;;  %s2410_s6 = inlined_call_operand.vmem [shape: f32[32,32], index: 6, kind: input, shape index: {}]   ;;  %s2411_s7 = inlined_call_operand.hbm [shape: f32[1,32], index: 7, kind: input, shape index: {}]   ;;  %s2412_s8 = inlined_call_operand.vmem [shape: f32[64,32], index: 8, kind: input, shape index: {}]   ;;  %s2413_s9 = inlined_call_operand.hbm [shape: f32[1,32], index: 9, kind: input, shape index: {}]   ;;  %s2414_s10 = inlined_call_operand.vmem [shape: f32[32,128], index: 10, kind: input, shape index: {}]   ;;  %s2415_s11 = inlined_call_operand.vmem [shape: f32[1,128], index: 11, kind: input, shape index: {}]   ;;  %s2416_s12 = inlined_call_operand.<no memory space> [shape: f32[1,1], index: 12, kind: input, shape index: {}]   ;;  %s2417_s13 = inlined_call_operand.hbm [shape: f32[8,128], index: 13, kind: output, shape index: {}]  }
   0x1   :  { %20 = vsyncpa [#allocation7], 0 }
   0x2   :  { %21 = vsyncpa [#allocation5], 0  ;;  %s1971_s25 = smov [#allocation6]   ;;  %s1972_s27 = smov [#allocation3]  }
   0x3   :  { %s50_s26 = sshll.u32 %s1971_s25, 4  ;;  %s38_s28 = sshll.u32 %s1972_s27, 4  ;;  %s51_s26 = int_to_ptr.vmem [resolvable:$true] %s50_s26  ;;  %s39_s28 = int_to_ptr.vmem [resolvable:$true] %s38_s28 }
   0x4   :  { %s1893_s29 = scalar_lea.vmem %s51_s26, 16  ;;  %s1897_s30 = scalar_lea.vmem %s51_s26, 32 }
   0x5   :  { %p1894_p0 = scmp.ne.s32.totalorder %s51_s26, %s1893_s29  ;;  %p1898_p1 = scmp.lt.s32.totalorder %s51_s26, %s51_s26 }
   0x6   :  { %p1899_p2 = scmp.lt.s32.totalorder %s1897_s30, %s1893_s29 }
   0x8   :  { %p1900_p3 = por %p1899_p2, %p1898_p1 }
   0xa   :  { %p1901_p4 = pnand %p1900_p3, %p1894_p0 }
   0xc   :  { %1904 = shalt.err (!%p1901_p4)
}
   0xd   :  { %53 = dma.hbm_to_vmem [thread:$0]  %s2411_s7, 16, %s51_s26, [#allocation7]  }
   0xe   :  { %s1913_s16 = scalar_lea.vmem %s39_s28, 16  ;;  %s1917_s17 = scalar_lea.vmem %s39_s28, 32 }
   0xf   :  { %p1914_p5 = scmp.ne.s32.totalorder %s39_s28, %s1913_s16  ;;  %p1918_p6 = scmp.lt.s32.totalorder %s39_s28, %s39_s28 }
  0x10   :  { %p1919_p7 = scmp.lt.s32.totalorder %s1917_s17, %s1913_s16 }
  0x12   :  { %p1920_p8 = por %p1919_p7, %p1918_p6 }
  0x14   :  { %p1921_p9 = pnand %p1920_p8, %p1914_p5 }
  0x16   :  { %1924 = shalt.err (!%p1921_p9)
}
  0x17   :  { %41 = dma.hbm_to_vmem [thread:$0]  %s2409_s5, 16, %s39_s28, [#allocation4]  }
  0x18   :  { %s1973_s20 = smov [#allocation8]  }
  0x19   :  { %s62_s21 = sshll.u32 %s1973_s20, 4  ;;  %s63_s21 = int_to_ptr.vmem [resolvable:$true] %s62_s21 }
  0x1a   :  { %s1933_s22 = scalar_lea.vmem %s63_s21, 16  ;;  %s1937_s23 = scalar_lea.vmem %s63_s21, 32 }
  0x1b   :  { %p1934_p10 = scmp.ne.s32.totalorder %s63_s21, %s1933_s22  ;;  %p1938_p11 = scmp.lt.s32.totalorder %s63_s21, %s63_s21 }
  0x1c   :  { %p1939_p12 = scmp.lt.s32.totalorder %s1937_s23, %s1933_s22 }
  0x1e   :  { %p1940_p13 = por %p1939_p12, %p1938_p11 }
  0x20   :  { %p1941_p0 = pnand %p1940_p13, %p1934_p10 }
  0x22   :  { %1944 = shalt.err (!%p1941_p0)
}
  0x23   :  { %65 = dma.hbm_to_vmem [thread:$0]  %s2413_s9, 16, %s63_s21, [#allocation7]  }
  0x24   :  { %1965 = dma.done.wait [#allocation4], 16  }
  0x25   :  { %1966 = vsyncadd [#allocation4], 4294967280 }
  0x26   :  { %1967 = dma.done.wait [#allocation7], 32  }
  0x27   :  { %1968 = vsyncadd [#allocation7], 4294967264  ;;  %v1974_v0 = vmov 0   ;;  %v1975_v1 = vmov 0.0   ;;  %v81_v2 = vld [vmem:[%s2404_s0] sm:$0xff]  ;;  %v142_v3 = vld [vmem:[%s2405_s1 + $0x18] sm:$0xff]  ;;  %v89_v12 = vlaneseq }
  0x28   :  { %1819 = vset.pattern.permute.xlu0 %v1974_v0  ;;  %1820 = vset.pattern.permute.xlu1 %v1974_v0  ;;  %v141_v4 = vld [vmem:[%s2405_s1 + $0x10] sm:$0xff]  ;;  %v2072_v5 = vld [vmem:[%s2407_s3 + $0x18] sm:$0xff]  ;;  %v82_v6 = vld [vmem:[%s2404_s0 + $0x8] sm:$0xff]  ;;  %vm1976_vm0 = vmmov 0   ;;  %vm150_vm1 = vcmask 261120   ;;  %s1977_s5 = smov 64  }
  0x29   :  { %1667 = vmatprep.subr.mxu1 %v1975_v1  ;;  %92 = vperm.xlu0 %1819, %v81_v2   ;;  %v140_v7 = vld [vmem:[%s2405_s1 + $0x8] sm:$0xff]  ;;  %v2084_v8 = vld [vmem:[%s2407_s3 + $0x10] sm:$0xff]  ;;  %v139_v9 = vld [vmem:[%s2405_s1] sm:$0xff]  ;;  %v2120_v13 = vand.u32 127, %v89_v12  ;;  %s1978_s25 = smov 32  }
  0x2a   :  { %1647 = vmatprep.subr.mxu0 %v142_v3  ;;  %1668 = vmatpush3.msra.mxu1 %v2072_v5  ;;  %v2094_v10 = vld [vmem:[%s2407_s3 + $0x8] sm:$0xff]  ;;  %v2100_v11 = vld [vmem:[%s2407_s3] sm:$0xff]  ;;  %v83_v51 = vld [vmem:[%s2404_s0 + $0x10] sm:$0xff] }
  0x2b   :  { %1648 = vmatpush3.msra.mxu0 %v142_v3  ;;  %1669 = vmatprep.subr.mxu1 %v1975_v1  ;;  %v2141_v22 = vld [vmem:[%s2406_s2] ss:$0 sm:$0xff]  ;;  %v87_v53 = vld [vmem:[%s2404_s0 + $0x30] sm:$0xff]  ;;  %v84_v61 = vld [vmem:[%s2404_s0 + $0x18] sm:$0xff] }
  0x2c   :  { %1649 = vmatprep.subr.mxu0 %v141_v4  ;;  %1670 = vmatpush3.msra.mxu1 %v2084_v8  ;;  %v85_v52 = vld [vmem:[%s2404_s0 + $0x20] sm:$0xff]  ;;  %v86_v62 = vld [vmem:[%s2404_s0 + $0x28] sm:$0xff]  ;;  %v88_v63 = vld [vmem:[%s2404_s0 + $0x38] sm:$0xff] }
  0x2d   :  { %1650 = vmatpush3.msra.mxu0 %v141_v4  ;;  %95 = vperm.xlu0 %1819, %v82_v6  }
  0x2e   :  { %1651 = vmatprep.subr.mxu0 %v140_v7  ;;  %1671 = vmatprep.subr.mxu1 %v1975_v1 }
  0x2f   :  { %1652 = vmatpush3.msra.mxu0 %v140_v7  ;;  %1672 = vmatpush3.msra.mxu1 %v2094_v10 }
  0x30   :  { %1653 = vmatprep.subr.mxu0 %v139_v9  ;;  %1673 = vmatprep.subr.mxu1 %v1975_v1 }
  0x31   :  { %1654 = vmatpush3.msra.mxu0 %v139_v9  ;;  %1674 = vmatpush3.msra.mxu1 %v2100_v11 }
  0x32   :  { %1675 = vmatprep.mubr.msk.f32.mxu1 %vm1976_vm0, %v1975_v1  ;;  %1678 = vmatprep.subr.mxu1 %v1975_v1 }
  0x33   :  { %1676 = vmatmul.mubr.f32.vlgmr.msra.gmra.mxu1 %v1975_v1  ;;  %1689 = vmatprep.subr.mxu0 %v1975_v1 }
  0x34   :  { %1679 = vmatpush3.msra.mxu1 %v2072_v5  ;;  %1686 = vmatprep.mubr.msk.f32.mxu1 %vm1976_vm0, %v1975_v1 }
  0x35   :  { %1680 = vmatprep.subr.mxu1 %v1975_v1 }
  0x36   :  { %1681 = vmatpush3.msra.mxu1 %v2084_v8 }
  0x37   :  { %1682 = vmatprep.subr.mxu1 %v1975_v1 }
  0x38   :  { %1683 = vmatpush3.msra.mxu1 %v2094_v10 }
  0x39   :  { %1684 = vmatprep.subr.mxu1 %v1975_v1 }
  0x3a   :  { %1685 = vmatpush3.msra.mxu1 %v2100_v11 }
  0x3b   :  { %1700 = vmatprep.subr.mxu1 %v1975_v1 }
  0xa4   :  { %v93_v14 = vpop.permute.xlu0 %92 }
  0xa5   :  { %vm115_vm2 = vcmp.eq.s32.totalorder %v2120_v13, %v93_v14 }
  0xa6   :  { %v1529_v15 = vsel %vm115_vm2, 1.0, %v1975_v1 }
  0xa7   :  { %1655 = vmatprep.mubr.msk.f32.mxu0 %vm150_vm1, %v1529_v15 }
  0xa8   :  { %v96_v16 = vpop.permute.xlu0 %95 }
  0xa9   :  { %vm116_vm3 = vcmp.eq.s32.totalorder %v2120_v13, %v96_v16 }
  0xaa   :  { %v1530_v17 = vsel %vm116_vm3, 1.0, %v1975_v1 }
  0xab   :  { %v2127_v18 = vadd.f32 %v1530_v17, %v1529_v15  ;;  %1656 = vmatmul.mubr.msk.f32.vlgmr.msra.gmra.mxu0 %vm150_vm1, %v1530_v17 }
  0xac   :  { %1690 = vmatpush3.msra.mxu0 %v2072_v5 }
  0xad   :  { %1691 = vmatprep.subr.mxu0 %v1975_v1 }
  0xae   :  { %1692 = vmatpush3.msra.mxu0 %v2084_v8 }
  0xaf   :  { %1693 = vmatprep.subr.mxu0 %v1975_v1 }
  0xb0   :  { %1694 = vmatpush3.msra.mxu0 %v2094_v10 }
  0xb1   :  { %1695 = vmatprep.subr.mxu0 %v1975_v1 }
  0xb2   :  { %1696 = vmatpush3.msra.mxu0 %v2100_v11 }
  0xb3   :  { %1711 = vmatprep.subr.mxu0 %v1975_v1 }
  0xf3   :  { %v353_v19 = vpop.f32.mrf.mxu1 }
  0xf5   :  { %v1677_v20 = vpop.f32.mrf.mxu1 }
 0x16b   :  { %v1657_v21 = vpop.f32.mrf.mxu0 }
 0x16c   :  { %v247_v40 = vadd.f32 %v1657_v21, %v2141_v22 }
 0x16d   :  { %v241_v23 = vpop.f32.mrf.mxu0 }
 0x16e   :  { %v242_v24 = vadd.f32 %v2141_v22, %v241_v23 }
 0x170   :  { %v357_v25 = vadd.f32 %v353_v19, %v242_v24 }
 0x172   :  { %1821 = vtanh.f32 %v357_v25  ;;  %v1546_v27 = vmul.f32 -1.442695, %v357_v25 }
 0x174   :  { %1823 = vpow2.f32 %v1546_v27 }
 0x17f   :  { %v1822_v26 = vpop.eup %1821 }
 0x180   :  { %367 = vrot.lane.b32.xlu1 %v1822_v26, %s1977_s5 }
 0x181   :  { %v1824_v28 = vpop.eup %1823 }
 0x182   :  { %v361_v29 = vadd.f32 1.0, %v1824_v28 }
 0x184   :  { %1825 = vrcp.f32 %v361_v29 }
 0x191   :  { %v1826_v30 = vpop.eup %1825 }
 0x192   :  { %v365_v33 = vmul.f32 0.0, %v1826_v30 }
 0x1f2   :  { %v368_v31 = vpop.permute.xlu1 %367 }
 0x1f3   :  { %v370_v32 = vmul.f32 %v1826_v30, %v368_v31 }
 0x1f5   :  { %372 = vrot.lane.b32.xlu1 %v370_v32, %s1978_s25 }
 0x267   :  { %v373_v34 = vpop.permute.xlu1 %372 }
 0x268   :  { %v375_v35 = vadd.f32 %v373_v34, %v365_v33 }
 0x26a   :  { %1827 = vtanh.f32 %v375_v35 }
 0x277   :  { %v1828_v36 = vpop.eup %1827 }
 0x278   :  { %378 = vrot.lane.b32.xlu0 %v1828_v36, %s1977_s5 }
 0x2ea   :  { %v379_v37 = vpop.permute.xlu0 %378 }
 0x2eb   :  { %v381_v38 = vmul.f32 %v1826_v30, %v379_v37 }
 0x2ed   :  { %383 = vrot.lane.b32.xlu1 %v381_v38, %s1978_s25 }
 0x35f   :  { %v384_v39 = vpop.permute.xlu1 %383 }
 0x360   :  { %1687 = vmatmul.mubr.msk.f32.vlgmr.msra.gmra.mxu1 %vm150_vm1, %v384_v39 }
 0x361   :  { %1701 = vmatpush3.msra.mxu1 %v2072_v5  ;;  %1708 = vmatprep.mubr.msk.f32.mxu1 %vm1976_vm0, %v1975_v1 }
 0x362   :  { %1702 = vmatprep.subr.mxu1 %v1975_v1 }
 0x363   :  { %1703 = vmatpush3.msra.mxu1 %v2084_v8 }
 0x364   :  { %1704 = vmatprep.subr.mxu1 %v1975_v1 }
 0x365   :  { %1705 = vmatpush3.msra.mxu1 %v2094_v10 }
 0x366   :  { %1706 = vmatprep.subr.mxu1 %v1975_v1 }
 0x367   :  { %1707 = vmatpush3.msra.mxu1 %v2100_v11 }
 0x368   :  { %1722 = vmatprep.subr.mxu1 %v1975_v1 }
 0x420   :  { %v453_v41 = vpop.f32.mrf.mxu1 }
 0x421   :  { %v457_v42 = vadd.f32 %v453_v41, %v247_v40 }
 0x422   :  { %v1688_v43 = vpop.f32.mrf.mxu1 }
 0x423   :  { %1829 = vtanh.f32 %v457_v42  ;;  %v1548_v45 = vmul.f32 -1.442695, %v457_v42 }
 0x425   :  { %1831 = vpow2.f32 %v1548_v45 }
 0x430   :  { %v1830_v44 = vpop.eup %1829 }
 0x431   :  { %467 = vrot.lane.b32.xlu0 %v1830_v44, %s1977_s5 }
 0x432   :  { %v1832_v46 = vpop.eup %1831 }
 0x433   :  { %v461_v47 = vadd.f32 1.0, %v1832_v46 }
 0x435   :  { %1833 = vrcp.f32 %v461_v47 }
 0x442   :  { %v1834_v48 = vpop.eup %1833 }
 0x443   :  { %v465_v54 = vmul.f32 %v1834_v48, %v375_v35 }
 0x4a3   :  { %v468_v49 = vpop.permute.xlu0 %467 }
 0x4a4   :  { %v470_v50 = vmul.f32 %v1834_v48, %v468_v49 }
 0x4a6   :  { %472 = vrot.lane.b32.xlu1 %v470_v50, %s1978_s25 }
 0x4aa   :  { %98 = vperm.xlu1 %1820, %v83_v51  }
 0x4ae   :  { %104 = vperm.xlu1 %1820, %v85_v52  }
 0x4b2   :  { %110 = vperm.xlu1 %1820, %v87_v53  }
 0x518   :  { %v473_v55 = vpop.permute.xlu1 %472 }
 0x519   :  { %v2171_v56 = vadd.f32 %v473_v55, %v465_v54 }
 0x51b   :  { %1835 = vtanh.f32 %v2171_v56 }
 0x525   :  { %v99_v57 = vpop.permute.xlu1 %98 }
 0x526   :  { %vm117_vm4 = vcmp.eq.s32.totalorder %v2120_v13, %v99_v57 }
 0x527   :  { %v1531_v58 = vsel %vm117_vm4, 1.0, %v1975_v1 }
 0x528   :  { %v1836_v59 = vpop.eup %1835  ;;  %v1083_v60 = vadd.f32 %v1531_v58, %v2127_v18  ;;  %1658 = vmatprep.mubr.msk.f32.mxu0 %vm150_vm1, %v1531_v58 }
 0x529   :  { %478 = vrot.lane.b32.xlu0 %v1836_v59, %s1977_s5  ;;  %v105_v3 = vpop.permute.xlu1 %104 }
 0x52a   :  { %vm119_vm5 = vcmp.eq.s32.totalorder %v2120_v13, %v105_v3 }
 0x52b   :  { %v1533_v7 = vsel %vm119_vm5, 1.0, %v1975_v1 }
 0x52d   :  { %101 = vperm.xlu0 %1819, %v84_v61   ;;  %v111_v4 = vpop.permute.xlu1 %110 }
 0x52e   :  { %vm121_vm7 = vcmp.eq.s32.totalorder %v2120_v13, %v111_v4 }
 0x52f   :  { %v1535_v16 = vsel %vm121_vm7, 1.0, %v1975_v1 }
 0x531   :  { %107 = vperm.xlu0 %1819, %v86_v62  }
 0x535   :  { %113 = vperm.xlu0 %1819, %v88_v63  }
 0x59b   :  { %v479_v0 = vpop.permute.xlu0 %478 }
 0x59c   :  { %v481_v2 = vmul.f32 %v1834_v48, %v479_v0 }
 0x59e   :  { %483 = vrot.lane.b32.xlu1 %v481_v2, %s1978_s25 }
 0x5a8   :  { %v102_v6 = vpop.permute.xlu0 %101 }
 0x5a9   :  { %vm118_vm6 = vcmp.eq.s32.totalorder %v2120_v13, %v102_v6 }
 0x5aa   :  { %v1532_v9 = vsel %vm118_vm6, 1.0, %v1975_v1 }
 0x5ab   :  { %v1084_v12 = vadd.f32 %v1532_v9, %v1083_v60  ;;  %1659 = vmatmul.mubr.msk.f32.gmra.mxu0 %vm150_vm1, %v1532_v9 }
 0x5ac   :  { %v108_v14 = vpop.permute.xlu0 %107  ;;  %1661 = vmatprep.mubr.msk.f32.mxu0 %vm150_vm1, %v1533_v7 }
 0x5ad   :  { %v1085_v15 = vadd.f32 %v1533_v7, %v1084_v12  ;;  %vm120_vm8 = vcmp.eq.s32.totalorder %v2120_v13, %v108_v14 }
 0x5ae   :  { %v1534_v17 = vsel %vm120_vm8, 1.0, %v1975_v1 }
 0x5af   :  { %v1086_v18 = vadd.f32 %v1534_v17, %v1085_v15  ;;  %1662 = vmatmul.mubr.msk.f32.gmra.mxu0 %vm150_vm1, %v1534_v17 }
 0x5b0   :  { %v114_v19 = vpop.permute.xlu0 %113  ;;  %1664 = vmatprep.mubr.msk.f32.mxu0 %vm150_vm1, %v1535_v16 }
 0x5b1   :  { %v1087_v20 = vadd.f32 %v1535_v16, %v1086_v18  ;;  %vm122_vm9 = vcmp.eq.s32.totalorder %v2120_v13, %v114_v19 }
 0x5b2   :  { %v1536_v21 = vsel %vm122_vm9, 1.0, %v1975_v1 }
 0x5b3   :  { %v2203_v23 = vadd.f32 %v1536_v21, %v1087_v20  ;;  %1665 = vmatmul.mubr.msk.f32.gmra.mxu0 %vm150_vm1, %v1536_v21 }
 0x5b4   :  { %1697 = vmatprep.mubr.msk.f32.mxu0 %vm1976_vm0, %v1975_v1 }
 0x610   :  { %v484_v24 = vpop.permute.xlu1 %483 }
 0x611   :  { %1698 = vmatmul.mubr.msk.f32.vlgmr.msra.gmra.mxu0 %vm150_vm1, %v484_v24 }
 0x612   :  { %1712 = vmatpush3.msra.mxu0 %v2072_v5  ;;  %1719 = vmatprep.mubr.msk.f32.mxu0 %vm1976_vm0, %v1975_v1 }
 0x613   :  { %1713 = vmatprep.subr.mxu0 %v1975_v1 }
 0x614   :  { %1714 = vmatpush3.msra.mxu0 %v2084_v8 }
 0x615   :  { %1715 = vmatprep.subr.mxu0 %v1975_v1 }
 0x616   :  { %1716 = vmatpush3.msra.mxu0 %v2094_v10 }
 0x617   :  { %1717 = vmatprep.subr.mxu0 %v1975_v1 }
 0x618   :  { %1718 = vmatpush3.msra.mxu0 %v2100_v11 }
 0x619   :  { %1733 = vmatprep.subr.mxu0 %v1975_v1 }
 0x66b   :  { %v1660_v13 = vpop.f32.mrf.mxu0 }
 0x66c   :  { %v257_v48 = vadd.f32 %v1660_v13, %v2141_v22 }
 0x66d   :  { %v251_v25 = vpop.f32.mrf.mxu0 }
 0x66e   :  { %v252_v30 = vadd.f32 %v2141_v22, %v251_v25 }
 0x66f   :  { %v2219_v26 = vpop.f32.mrf.mxu0 }
 0x671   :  { %v2221_v27 = vpop.f32.mrf.mxu0 }
 0x672   :  { %v262_v3 = vadd.f32 %v2141_v22, %v2221_v27 }
 0x673   :  { %v2223_v28 = vpop.f32.mrf.mxu0 }
 0x675   :  { %v2225_v29 = vpop.f32.mrf.mxu0 }
 0x6d1   :  { %v553_v31 = vpop.f32.mrf.mxu0 }
 0x6d2   :  { %v557_v32 = vadd.f32 %v553_v31, %v252_v30 }
 0x6d3   :  { %v1699_v33 = vpop.f32.mrf.mxu0 }
 0x6d4   :  { %1837 = vtanh.f32 %v557_v32  ;;  %v1550_v35 = vmul.f32 -1.442695, %v557_v32 }
 0x6d6   :  { %1839 = vpow2.f32 %v1550_v35 }
 0x6e1   :  { %v1838_v34 = vpop.eup %1837 }
 0x6e2   :  { %567 = vrot.lane.b32.xlu0 %v1838_v34, %s1977_s5 }
 0x6e3   :  { %v1840_v36 = vpop.eup %1839 }
 0x6e4   :  { %v561_v37 = vadd.f32 1.0, %v1840_v36 }
 0x6e6   :  { %1841 = vrcp.f32 %v561_v37 }
 0x6f3   :  { %v1842_v38 = vpop.eup %1841 }
 0x6f4   :  { %v565_v41 = vmul.f32 %v1842_v38, %v2171_v56 }
 0x754   :  { %v568_v39 = vpop.permute.xlu0 %567 }
 0x755   :  { %v570_v40 = vmul.f32 %v1842_v38, %v568_v39 }
 0x757   :  { %572 = vrot.lane.b32.xlu1 %v570_v40, %s1978_s25 }
 0x7c9   :  { %v573_v42 = vpop.permute.xlu1 %572 }
 0x7ca   :  { %v575_v43 = vadd.f32 %v573_v42, %v565_v41  ;;  %v1093_v42 = vld [vmem:[%s2408_s4 + $0x18] sm:$0xff] }
 0x7cc   :  { %1843 = vtanh.f32 %v575_v43 }
 0x7d9   :  { %v1844_v44 = vpop.eup %1843 }
 0x7da   :  { %578 = vrot.lane.b32.xlu0 %v1844_v44, %s1977_s5  ;;  %v1092_v44 = vld [vmem:[%s2408_s4 + $0x10] sm:$0xff] }
 0x84c   :  { %v579_v45 = vpop.permute.xlu0 %578 }
 0x84d   :  { %v581_v46 = vmul.f32 %v1842_v38, %v579_v45  ;;  %v1091_v45 = vld [vmem:[%s2408_s4 + $0x8] sm:$0xff] }
 0x84f   :  { %583 = vrot.lane.b32.xlu1 %v581_v46, %s1978_s25  ;;  %v1090_v46 = vld [vmem:[%s2408_s4] sm:$0xff] }
 0x8c1   :  { %v584_v47 = vpop.permute.xlu1 %583 }
 0x8c2   :  { %1709 = vmatmul.mubr.msk.f32.vlgmr.msra.gmra.mxu1 %vm150_vm1, %v584_v47  ;;  %v1089_v47 = vmul.f32 0.125, %v2203_v23 }
 0x8c3   :  { %1723 = vmatpush3.msra.mxu1 %v2072_v5  ;;  %1730 = vmatprep.mubr.msk.f32.mxu1 %vm1976_vm0, %v1975_v1 }
 0x8c4   :  { %1724 = vmatprep.subr.mxu1 %v1975_v1 }
 0x8c5   :  { %1725 = vmatpush3.msra.mxu1 %v2084_v8 }
 0x8c6   :  { %1726 = vmatprep.subr.mxu1 %v1975_v1 }
 0x8c7   :  { %1727 = vmatpush3.msra.mxu1 %v2094_v10 }
 0x8c8   :  { %1728 = vmatprep.subr.mxu1 %v1975_v1 }
 0x8c9   :  { %1729 = vmatpush3.msra.mxu1 %v2100_v11 }
 0x8ca   :  { %1744 = vmatprep.subr.mxu1 %v1975_v1 }
 0x982   :  { %v653_v49 = vpop.f32.mrf.mxu1 }
 0x983   :  { %v657_v50 = vadd.f32 %v653_v49, %v257_v48  ;;  %v272_v48 = vadd.f32 %v2141_v22, %v2225_v29 }
 0x984   :  { %v1710_v51 = vpop.f32.mrf.mxu1 }
 0x985   :  { %1845 = vtanh.f32 %v657_v50  ;;  %v1552_v53 = vmul.f32 -1.442695, %v657_v50 }
 0x987   :  { %1847 = vpow2.f32 %v1552_v53 }
 0x992   :  { %v1846_v52 = vpop.eup %1845 }
 0x993   :  { %667 = vrot.lane.b32.xlu0 %v1846_v52, %s1977_s5 }
 0x994   :  { %v1848_v54 = vpop.eup %1847 }
 0x995   :  { %v661_v55 = vadd.f32 1.0, %v1848_v54 }
 0x997   :  { %1849 = vrcp.f32 %v661_v55 }
 0x9a4   :  { %v1850_v56 = vpop.eup %1849 }
 0x9a5   :  { %v665_v59 = vmul.f32 %v1850_v56, %v575_v43 }
 0xa05   :  { %v668_v57 = vpop.permute.xlu0 %667 }
 0xa06   :  { %v670_v58 = vmul.f32 %v1850_v56, %v668_v57 }
 0xa08   :  { %672 = vrot.lane.b32.xlu1 %v670_v58, %s1978_s25 }
 0xa7a   :  { %v673_v60 = vpop.permute.xlu1 %672 }
 0xa7b   :  { %v675_v61 = vadd.f32 %v673_v60, %v665_v59 }
 0xa7d   :  { %1851 = vtanh.f32 %v675_v61 }
 0xa8a   :  { %v1852_v62 = vpop.eup %1851 }
 0xa8b   :  { %678 = vrot.lane.b32.xlu0 %v1852_v62, %s1977_s5 }
 0xafd   :  { %v679_v63 = vpop.permute.xlu0 %678 }
 0xafe   :  { %v681_v0 = vmul.f32 %v1850_v56, %v679_v63 }
 0xb00   :  { %683 = vrot.lane.b32.xlu1 %v681_v0, %s1978_s25 }
 0xb72   :  { %v684_v2 = vpop.permute.xlu1 %683 }
 0xb73   :  { %1720 = vmatmul.mubr.msk.f32.vlgmr.msra.gmra.mxu0 %vm150_vm1, %v684_v2  ;;  %v1178_v2 = vld [vmem:[%s2410_s6 + $0x18] sm:$0xff] }
 0xb74   :  { %1734 = vmatpush3.msra.mxu0 %v2072_v5  ;;  %1741 = vmatprep.mubr.msk.f32.mxu0 %vm1976_vm0, %v1975_v1 }
 0xb75   :  { %1735 = vmatprep.subr.mxu0 %v1975_v1 }
 0xb76   :  { %1736 = vmatpush3.msra.mxu0 %v2084_v8 }
 0xb77   :  { %1737 = vmatprep.subr.mxu0 %v1975_v1 }
 0xb78   :  { %1738 = vmatpush3.msra.mxu0 %v2094_v10 }
 0xb79   :  { %1739 = vmatprep.subr.mxu0 %v1975_v1 }
 0xb7a   :  { %1740 = vmatpush3.msra.mxu0 %v2100_v11 }
 0xb7b   :  { %1755 = vmatprep.subr.mxu0 %v1975_v1 }
 0xc33   :  { %v753_v4 = vpop.f32.mrf.mxu0 }
 0xc34   :  { %v757_v6 = vadd.f32 %v753_v4, %v262_v3  ;;  %v1561_v3 = vld [vmem:[#allocation3] ss:$0 sm:$0xff] }
 0xc35   :  { %v1721_v7 = vpop.f32.mrf.mxu0 }
 0xc36   :  { %1853 = vtanh.f32 %v757_v6  ;;  %v1554_v12 = vmul.f32 -1.442695, %v757_v6  ;;  %v1177_v6 = vld [vmem:[%s2410_s6 + $0x10] sm:$0xff] }
 0xc38   :  { %1855 = vpow2.f32 %v1554_v12  ;;  %v1175_v12 = vld [vmem:[%s2410_s6] sm:$0xff] }
 0xc43   :  { %v1854_v9 = vpop.eup %1853 }
 0xc44   :  { %767 = vrot.lane.b32.xlu0 %v1854_v9, %s1977_s5  ;;  %v1176_v9 = vld [vmem:[%s2410_s6 + $0x8] sm:$0xff] }
 0xc45   :  { %v1856_v14 = vpop.eup %1855 }
 0xc46   :  { %v761_v15 = vadd.f32 1.0, %v1856_v14 }
 0xc48   :  { %1857 = vrcp.f32 %v761_v15  ;;  %v1268_v15 = vld [vmem:[%s2412_s8 + $0x38] sm:$0xff] }
 0xc55   :  { %v1858_v16 = vpop.eup %1857 }
 0xc56   :  { %v765_v19 = vmul.f32 %v1858_v16, %v675_v61 }
 0xcb6   :  { %v768_v17 = vpop.permute.xlu0 %767 }
 0xcb7   :  { %v770_v18 = vmul.f32 %v1858_v16, %v768_v17  ;;  %v1266_v17 = vld [vmem:[%s2412_s8 + $0x28] sm:$0xff] }
 0xcb9   :  { %772 = vrot.lane.b32.xlu1 %v770_v18, %s1978_s25  ;;  %v1265_v18 = vld [vmem:[%s2412_s8 + $0x20] sm:$0xff] }
 0xd2b   :  { %v773_v20 = vpop.permute.xlu1 %772 }
 0xd2c   :  { %v775_v21 = vadd.f32 %v773_v20, %v765_v19  ;;  %v277_v19 = vadd.f32 %v2223_v28, %v2141_v22 }
 0xd2e   :  { %1859 = vtanh.f32 %v775_v21 }
 0xd3b   :  { %v1860_v24 = vpop.eup %1859 }
 0xd3c   :  { %778 = vrot.lane.b32.xlu0 %v1860_v24, %s1977_s5 }
 0xdae   :  { %v779_v13 = vpop.permute.xlu0 %778 }
 0xdaf   :  { %v781_v25 = vmul.f32 %v1858_v16, %v779_v13  ;;  %v1267_v16 = vld [vmem:[%s2412_s8 + $0x30] sm:$0xff]  ;;  %v1563_v13 = vld [vmem:[#allocation6] ss:$0 sm:$0xff] }
 0xdb1   :  { %783 = vrot.lane.b32.xlu1 %v781_v25, %s1978_s25 }
 0xe23   :  { %v784_v27 = vpop.permute.xlu1 %783 }
 0xe24   :  { %1731 = vmatmul.mubr.msk.f32.vlgmr.msra.gmra.mxu1 %vm150_vm1, %v784_v27 }
 0xe25   :  { %1745 = vmatpush3.msra.mxu1 %v2072_v5  ;;  %1752 = vmatprep.mubr.msk.f32.mxu1 %vm1976_vm0, %v1975_v1  ;;  %v267_v5 = vadd.f32 %v2219_v26, %v2141_v22 }
 0xe26   :  { %1746 = vmatprep.subr.mxu1 %v1975_v1 }
 0xe27   :  { %1747 = vmatpush3.msra.mxu1 %v2084_v8 }
 0xe28   :  { %1748 = vmatprep.subr.mxu1 %v1975_v1 }
 0xe29   :  { %1749 = vmatpush3.msra.mxu1 %v2094_v10 }
 0xe2a   :  { %1750 = vmatprep.subr.mxu1 %v1975_v1 }
 0xe2b   :  { %1751 = vmatpush3.msra.mxu1 %v2100_v11 }
 0xe2c   :  { %1766 = vmatprep.subr.mxu1 %v1975_v1 }
 0xee4   :  { %v853_v30 = vpop.f32.mrf.mxu1 }
 0xee5   :  { %v857_v31 = vadd.f32 %v853_v30, %v267_v5 }
 0xee6   :  { %v1732_v32 = vpop.f32.mrf.mxu1 }
 0xee7   :  { %1861 = vtanh.f32 %v857_v31  ;;  %v1556_v8 = vmul.f32 -1.442695, %v857_v31 }
 0xee9   :  { %1863 = vpow2.f32 %v1556_v8 }
 0xef4   :  { %v1862_v33 = vpop.eup %1861 }
 0xef5   :  { %867 = vrot.lane.b32.xlu0 %v1862_v33, %s1977_s5 }
 0xef6   :  { %v1864_v34 = vpop.eup %1863 }
 0xef7   :  { %v861_v10 = vadd.f32 1.0, %v1864_v34 }
 0xef9   :  { %1865 = vrcp.f32 %v861_v10 }
 0xf06   :  { %v1866_v35 = vpop.eup %1865 }
 0xf07   :  { %v865_v37 = vmul.f32 %v1866_v35, %v775_v21 }
 0xf67   :  { %v868_v36 = vpop.permute.xlu0 %867 }
 0xf68   :  { %v870_v11 = vmul.f32 %v1866_v35, %v868_v36 }
 0xf6a   :  { %872 = vrot.lane.b32.xlu1 %v870_v11, %s1978_s25 }
 0xfdc   :  { %v873_v38 = vpop.permute.xlu1 %872 }
 0xfdd   :  { %v875_v26 = vadd.f32 %v873_v38, %v865_v37  ;;  %v1264_v38 = vld [vmem:[%s2412_s8 + $0x18] sm:$0xff] }
 0xfdf   :  { %1867 = vtanh.f32 %v875_v26 }
 0xfec   :  { %v1868_v39 = vpop.eup %1867 }
 0xfed   :  { %878 = vrot.lane.b32.xlu0 %v1868_v39, %s1977_s5  ;;  %v1262_v39 = vld [vmem:[%s2412_s8 + $0x8] sm:$0xff] }
0x105f   :  { %v879_v40 = vpop.permute.xlu0 %878 }
0x1060   :  { %v881_v41 = vmul.f32 %v1866_v35, %v879_v40  ;;  %v1261_v40 = vld [vmem:[%s2412_s8] sm:$0xff] }
0x1062   :  { %883 = vrot.lane.b32.xlu1 %v881_v41, %s1978_s25 }
0x10d4   :  { %v884_v43 = vpop.permute.xlu1 %883 }
0x10d5   :  { %1742 = vmatmul.mubr.msk.f32.vlgmr.msra.gmra.mxu0 %vm150_vm1, %v884_v43 }
0x10d6   :  { %1756 = vmatpush3.msra.mxu0 %v1093_v42  ;;  %1763 = vmatprep.mubr.msk.f32.mxu0 %vm1976_vm0, %v1975_v1 }
0x10d7   :  { %1757 = vmatprep.subr.mxu0 %v1975_v1 }
0x10d8   :  { %1758 = vmatpush3.msra.mxu0 %v1092_v44 }
0x10d9   :  { %1759 = vmatprep.subr.mxu0 %v1975_v1 }
0x10da   :  { %1760 = vmatpush3.msra.mxu0 %v1091_v45  ;;  %v1431_v45 = vld [vmem:[%s2414_s10 + $0x18] sm:$0xff] }
0x10db   :  { %1761 = vmatprep.subr.mxu0 %v1975_v1 }
0x10dc   :  { %1762 = vmatpush3.msra.mxu0 %v1090_v46  ;;  %v1430_v46 = vld [vmem:[%s2414_s10 + $0x10] sm:$0xff] }
0x10dd   :  { %1764 = vmatmul.mubr.msk.f32.vlgmr.msra.gmra.mxu0 %vm150_vm1, %v1089_v47  ;;  %1777 = vmatprep.subr.mxu0 %v1975_v1  ;;  %v1429_v47 = vld [vmem:[%s2414_s10 + $0x8] sm:$0xff] }
0x10de   :  { %1785 = vmatprep.mubr.msk.f32.mxu0 %vm1976_vm0, %v1975_v1  ;;  %1778 = vmatpush3.msra.mxu0 %v1268_v15 }
0x10df   :  { %1779 = vmatprep.subr.mxu0 %v1975_v1 }
0x10e0   :  { %1780 = vmatpush3.msra.mxu0 %v1267_v16 }
0x10e1   :  { %1781 = vmatprep.subr.mxu0 %v1975_v1 }
0x10e2   :  { %1782 = vmatpush3.msra.mxu0 %v1266_v17 }
0x10e3   :  { %1783 = vmatprep.subr.mxu0 %v1975_v1 }
0x10e4   :  { %1784 = vmatpush3.msra.mxu0 %v1265_v18 }
0x10e5   :  { %1799 = vmatprep.subr.mxu0 %v1975_v1 }
0x1195   :  { %v953_v49 = vpop.f32.mrf.mxu0 }
0x1196   :  { %v957_v50 = vadd.f32 %v953_v49, %v272_v48  ;;  %v1428_v48 = vld [vmem:[%s2414_s10] sm:$0xff]  ;;  %s1979_s10 = smov [#allocation9]  }
0x1197   :  { %v1743_v51 = vpop.f32.mrf.mxu0  ;;  %s1519_s30 = sshll.u32 %s1979_s10, 4  ;;  %s1520_s30 = int_to_ptr.vmem [resolvable:$true] %s1519_s30 }
0x1198   :  { %1869 = vtanh.f32 %v957_v50  ;;  %v1558_v54 = vmul.f32 -1.442695, %v957_v50  ;;  %v1417_v50 = vstv %s2416_s12  ;;  %s1945_s12 = scalar_lea.vmem %s1520_s30, 128  ;;  %p1950_p2 = scmp.lt.s32.totalorder %s1520_s30, %s1520_s30 }
0x1199   :  { %p1946_p1 = scmp.ne.s32.totalorder %s1520_s30, %s1945_s12  ;;  %p1951_p3 = scmp.lt.s32.totalorder %s1945_s12, %s1945_s12 }
0x119a   :  { %1871 = vpow2.f32 %v1558_v54 }
0x119b   :  { %p1952_p4 = por %p1951_p3, %p1950_p2 }
0x119d   :  { %v1170_v52 = vpop.f32.mrf.mxu0  ;;  %p1953_p5 = pnand %p1952_p4, %p1946_p1 }
0x119e   :  { %v1171_v7 = vadd.f32 %v1561_v3, %v1170_v52  ;;  %v1567_v52 = vld [vmem:[#allocation8] ss:$0 sm:$0xff] }
0x119f   :  { %v1765_v53 = vpop.f32.mrf.mxu0 }
0x11a0   :  { %v1174_v14 = vmax.f32 %v1171_v7, 0.0 }
0x11a5   :  { %v1870_v23 = vpop.eup %1869 }
0x11a6   :  { %967 = vrot.lane.b32.xlu0 %v1870_v23, %s1977_s5 }
0x11a7   :  { %v1872_v55 = vpop.eup %1871 }
0x11a8   :  { %v961_v56 = vadd.f32 1.0, %v1872_v55 }
0x11aa   :  { %1873 = vrcp.f32 %v961_v56  ;;  %v1568_v56 = vld [vmem:[%s2415_s11] ss:$0 sm:$0xff] }
0x11b7   :  { %v1874_v57 = vpop.eup %1873 }
0x11b8   :  { %v965_v29 = vmul.f32 %v1874_v57, %v875_v26  ;;  %v1263_v26 = vld [vmem:[%s2412_s8 + $0x10] sm:$0xff] }
0x1218   :  { %v968_v58 = vpop.permute.xlu0 %967 }
0x1219   :  { %v970_v59 = vmul.f32 %v1874_v57, %v968_v58 }
0x121b   :  { %972 = vrot.lane.b32.xlu1 %v970_v59, %s1978_s25 }
0x128d   :  { %v973_v60 = vpop.permute.xlu1 %972 }
0x128e   :  { %v2310_v61 = vadd.f32 %v973_v60, %v965_v29 }
0x1290   :  { %1875 = vtanh.f32 %v2310_v61 }
0x129d   :  { %v1876_v62 = vpop.eup %1875 }
0x129e   :  { %978 = vrot.lane.b32.xlu0 %v1876_v62, %s1977_s5 }
0x1310   :  { %v979_v63 = vpop.permute.xlu0 %978 }
0x1311   :  { %v981_v0 = vmul.f32 %v1874_v57, %v979_v63 }
0x1313   :  { %983 = vrot.lane.b32.xlu1 %v981_v0, %s1978_s25 }
0x1385   :  { %v984_v4 = vpop.permute.xlu1 %983 }
0x1386   :  { %1753 = vmatmul.mubr.msk.f32.vlgmr.msra.gmra.mxu1 %vm150_vm1, %v984_v4 }
0x1387   :  { %1767 = vmatpush3.msra.mxu1 %v1178_v2  ;;  %1774 = vmatprep.mubr.msk.f32.mxu1 %vm1976_vm0, %v1975_v1 }
0x1388   :  { %1768 = vmatprep.subr.mxu1 %v1975_v1 }
0x1389   :  { %1769 = vmatpush3.msra.mxu1 %v1177_v6 }
0x138a   :  { %1770 = vmatprep.subr.mxu1 %v1975_v1 }
0x138b   :  { %1771 = vmatpush3.msra.mxu1 %v1176_v9 }
0x138c   :  { %1772 = vmatprep.subr.mxu1 %v1975_v1 }
0x138d   :  { %1773 = vmatpush3.msra.mxu1 %v1175_v12 }
0x138e   :  { %1775 = vmatmul.mubr.msk.f32.vlgmr.msra.gmra.mxu1 %vm150_vm1, %v1174_v14  ;;  %1788 = vmatprep.subr.mxu1 %v1975_v1 }
0x138f   :  { %1796 = vmatprep.mubr.msk.f32.mxu1 %vm1976_vm0, %v1975_v1  ;;  %1789 = vmatpush3.msra.mxu1 %v1264_v38 }
0x1390   :  { %1790 = vmatprep.subr.mxu1 %v1975_v1 }
0x1391   :  { %1791 = vmatpush3.msra.mxu1 %v1263_v26 }
0x1392   :  { %1792 = vmatprep.subr.mxu1 %v1975_v1 }
0x1393   :  { %1793 = vmatpush3.msra.mxu1 %v1262_v39 }
0x1394   :  { %1794 = vmatprep.subr.mxu1 %v1975_v1 }
0x1395   :  { %1795 = vmatpush3.msra.mxu1 %v1261_v40 }
0x1446   :  { %v1053_v20 = vpop.f32.mrf.mxu1 }
0x1447   :  { %v1057_v21 = vadd.f32 %v1053_v20, %v277_v19 }
0x1448   :  { %v1754_v24 = vpop.f32.mrf.mxu1 }
0x1449   :  { %1877 = vtanh.f32 %v1057_v21  ;;  %v1560_v32 = vmul.f32 -1.442695, %v1057_v21 }
0x144b   :  { %1879 = vpow2.f32 %v1560_v32 }
0x144e   :  { %v1255_v25 = vpop.f32.mrf.mxu1 }
0x144f   :  { %v1256_v27 = vadd.f32 %v1563_v13, %v1255_v25 }
0x1450   :  { %v1776_v5 = vpop.f32.mrf.mxu1 }
0x1451   :  { %v1259_v30 = vmax.f32 %v1256_v27, 0.0 }
0x1453   :  { %1786 = vmatmul.mubr.msk.f32.vlgmr.msra.gmra.mxu0 %vm150_vm1, %v1259_v30 }
0x1454   :  { %1807 = vmatprep.mubr.msk.f32.mxu0 %vm1976_vm0, %v1975_v1  ;;  %1800 = vmatpush3.msra.mxu0 %v1431_v45 }
0x1455   :  { %1801 = vmatprep.subr.mxu0 %v1975_v1 }
0x1456   :  { %v1878_v31 = vpop.eup %1877  ;;  %1802 = vmatpush3.msra.mxu0 %v1430_v46 }
0x1457   :  { %1067 = vrot.lane.b32.xlu0 %v1878_v31, %s1977_s5  ;;  %1803 = vmatprep.subr.mxu0 %v1975_v1 }
0x1458   :  { %v1880_v22 = vpop.eup %1879  ;;  %1804 = vmatpush3.msra.mxu0 %v1429_v47 }
0x1459   :  { %v1061_v28 = vadd.f32 1.0, %v1880_v22  ;;  %1805 = vmatprep.subr.mxu0 %v1975_v1 }
0x145a   :  { %1806 = vmatpush3.msra.mxu0 %v1428_v48 }
0x145b   :  { %1881 = vrcp.f32 %v1061_v28 }
0x1468   :  { %v1882_v33 = vpop.eup %1881 }
0x1469   :  { %v1065_v36 = vmul.f32 %v1882_v33, %v2310_v61 }
0x14c9   :  { %v1068_v8 = vpop.permute.xlu0 %1067 }
0x14ca   :  { %v1070_v34 = vmul.f32 %v1882_v33, %v1068_v8 }
0x14cc   :  { %1072 = vrot.lane.b32.xlu1 %v1070_v34, %s1978_s25 }
0x1513   :  { %v1338_v10 = vpop.f32.mrf.mxu0 }
0x1515   :  { %v1787_v35 = vpop.f32.mrf.mxu0 }
0x153e   :  { %v1073_v11 = vpop.permute.xlu1 %1072 }
0x153f   :  { %v1075_v37 = vadd.f32 %v1073_v11, %v1065_v36 }
0x1541   :  { %1883 = vtanh.f32 %v1075_v37 }
0x154e   :  { %v1884_v41 = vpop.eup %1883 }
0x154f   :  { %1078 = vrot.lane.b32.xlu0 %v1884_v41, %s1977_s5 }
0x15c1   :  { %v1079_v42 = vpop.permute.xlu0 %1078 }
0x15c2   :  { %v1081_v43 = vmul.f32 %v1882_v33, %v1079_v42 }
0x15c4   :  { %1343 = vrot.lane.b32.xlu1 %v1081_v43, %s1978_s25 }
0x1636   :  { %v1344_v44 = vpop.permute.xlu1 %1343 }
0x1637   :  { %1797 = vmatmul.mubr.msk.f32.vlgmr.msra.gmra.mxu1 %vm150_vm1, %v1344_v44 }
0x16f7   :  { %v1413_v49 = vpop.f32.mrf.mxu1 }
0x16f8   :  { %v1414_v51 = vadd.f32 %v1413_v49, %v1338_v10 }
0x16f9   :  { %v1798_v53 = vpop.f32.mrf.mxu1 }
0x16fa   :  { %v1418_v23 = vmul.f32 %v1417_v50, %v1414_v51 }
0x16fc   :  { %v1426_v54 = vadd.f32 %v1567_v52, %v1418_v23 }
0x16fe   :  { %v1427_v55 = vmax.f32 %v1426_v54, 0.0 }
0x1700   :  { %1808 = vmatmul.mubr.msk.f32.vlgmr.msra.gmra.mxu0 %vm150_vm1, %v1427_v55 }
0x17c0   :  { %v1508_v1 = vpop.f32.mrf.mxu0 }
0x17c1   :  { %v1509_v57 = vadd.f32 %v1568_v56, %v1508_v1 }
0x17c2   :  { %v1809_v58 = vpop.f32.mrf.mxu0 }
0x17c3   :  { %1512 = vst [vmem:[#allocation9] sm:$0xff] %v1509_v57 }
0x17c4   :  { %1956 = shalt.err (!%p1953_p5)
}
0x17c5   :  { %1522 = dma.vmem_to_hbm [thread:$0]  %s1520_s30, 128, %s2417_s13, [#allocation5]  }
0x17c6   :  { %1969 = dma.done.wait [#allocation5], 128  }
0x17c7   :  { %1970 = vsyncadd [#allocation5], 4294967168 }
0x17c8   :  { %1526 = vsyncpa [#allocation4], 1 }
0x17c9   :  { %1527 = vsyncpa [#allocation7], 1 }
0x17ca   :  { %1528 = vsyncpa [#allocation5], 1 }

</bundles_post_ra>
